<compile_context>
chip_gen: v6e
topology: v6e:2x2x1
jax: 0.10.0
libtpu: 0.0.40
codegen_flags: <defaults>
</compile_context>

<pallas_src>
import functools
import math

import jax
import jax.numpy as jnp
from jax.experimental import pallas as pl
from jax.experimental.pallas import tpu as pltpu


_TM_MAX_DEFAULT = 1024
_MIB = 1024 * 1024


def _vmem_limit_bytes():
    """Generation-aware scoped-VMEM limit: capacity - 24 MiB headroom, clamped
    to [32 MiB, 100 MiB] (=> ~40 MiB on v7x, ~100 MiB on v5e/v6e)."""
    cap = 64 * _MIB  # conservative fallback: v7x physical VMEM per TensorCore
    try:
        info = pltpu.get_tpu_info()
        for name in ("vmem_capacity_bytes", "vmem_size_bytes", "vmem_bytes"):
            val = getattr(info, name, None)
            if val:
                cap = int(val)
                break
    except Exception:
        pass
    return int(min(max(cap - 24 * _MIB, 32 * _MIB), 100 * _MIB))


def _choose_tm(n_tokens, hidden, itemsize, max_tm, vmem_limit):
    """Token-tile rows from the VMEM budget.

    Working set per row: double-buffered in + out tiles at the input dtype
    plus ~16 live 32-bit (TM, hidden) temporaries in the kernel body
    (x, score, out, rank / best_v / best_i, rolled partners, compares, nz)."""
    bytes_per_row = hidden * (4 * itemsize + 16 * 4)
    budget = max(vmem_limit - 8 * _MIB, 4 * _MIB)
    tm = budget // max(bytes_per_row, 1)
    tm = int(max(8, min(tm, max_tm)))
    tm = (tm // 8) * 8
    if n_tokens <= 8:
        return max(1, n_tokens)            # single block equal to the full dim
    tm = max(8, min(tm, (n_tokens // 8) * 8))
    # Keep the token grid >= 2 blocks once each half is still a big tile
    # (>= 256 rows), so both v7x TensorCores get work on the "parallel" axis.
    if n_tokens >= 512:
        half = -(-n_tokens // 2)
        tm = min(tm, ((half + 7) // 8) * 8)
    return max(8, tm)


def _balanced_topk_kernel(x_ref, bias_ref, off_ref, out_ref, count_ref, *,
                          topk, bank_size, total_tokens, block_tokens,
                          use_butterfly):
    x = x_ref[...].astype(jnp.float32)                         # (TM, Hp)
    score = jnp.abs(x) + bias_ref[...].astype(jnp.float32)     # bias is (1, Hp)
    tm, hidden = x.shape

    if use_butterfly:
        # Iterative per-bank arg-top-k via an XOR butterfly (pow2 bank_size).
        # Partner direction is an inline lane bit test (no stored masks):
        # partner lane^s is at lane - s when bit s is set (arrives via roll(+s)),
        # at lane + s otherwise (arrives via roll(hidden - s)).
        lane = jax.lax.broadcasted_iota(jnp.int32, (tm, hidden), 1)
        work = score
        picked = jnp.zeros(score.shape, jnp.bool_)
        # TODO(synk): for very large topk*log2(bank_size) move this to a
        #             lax.fori_loop to bound live ranges / vreg pressure.
        for _ in range(topk):
            best_v = work
            best_i = lane
            s = 1
            while s < bank_size:
                take_low = (lane & s) != 0
                pv = jnp.where(take_low,
                               pltpu.roll(best_v, shift=s, axis=1),
                               pltpu.roll(best_v, shift=hidden - s, axis=1))
                pi = jnp.where(take_low,
                               pltpu.roll(best_i, shift=s, axis=1),
                               pltpu.roll(best_i, shift=hidden - s, axis=1))
                better = (pv > best_v) | ((pv == best_v) & (pi < best_i))
                best_v = jnp.where(better, pv, best_v)
                best_i = jnp.where(better, pi, best_i)
                s *= 2
            win = lane == best_i               # exactly one lane per bank/token
            picked = picked | win
            work = jnp.where(win, -jnp.inf, work)
        pick = picked
    else:
        # Rank select: rank_i = #{same-bank lanes that beat lane i, ties going
        # to the lower index}; pick everything with rank < topk.  Only f32
        # score rolls (2*(bank_size-1) total), no i32 rolls, no topk loop.
        off = off_ref[...]                     # (1, Hp) static in-bank offsets
        rank = jnp.zeros(score.shape, jnp.int32)
        for d in range(1, bank_size):
            left = pltpu.roll(score, shift=d, axis=1)            # score[i - d]
            right = pltpu.roll(score, shift=hidden - d, axis=1)  # score[i + d]
            rank = rank + ((off >= d) & (left >= score)).astype(jnp.int32)
            rank = rank + ((off < bank_size - d) & (right > score)).astype(jnp.int32)
        pick = rank < topk

    out = jnp.where(pick, x, 0.0)
    out_ref[...] = out.astype(out_ref.dtype)

    # Per-block partial counts on the otherwise-idle MXU.  The ragged-tail row
    # mask is folded into the (1, TM) ones row (cheap), never a full-tile mask.
    nz = (out != 0.0).astype(jnp.bfloat16)                       # 0/1, exact
    row = jax.lax.broadcasted_iota(jnp.int32, (1, tm), 1)
    valid = (pl.program_id(0) * block_tokens + row) < total_tokens
    ones_row = valid.astype(jnp.bfloat16)
    count_ref[...] = jnp.dot(ones_row, nz,
                             preferred_element_type=jnp.float32)[None]


def balanced_topk(x, balanced_bias, topk, bank_size, num_assigned_tokens, *,
                  max_tm=_TM_MAX_DEFAULT):
    """Functional equivalent of BalancedTopkModule.forward (training=True).

    Returns (masked_output, updated_num_assigned_tokens)."""
    hidden = x.shape[-1]
    assert hidden % bank_size == 0
    assert 1 <= topk <= bank_size
    orig_shape = x.shape
    T = math.prod(x.shape[:-1]) if x.ndim > 1 else 1

    # Lane-dense layout: pad hidden up to a multiple of 128.  Padded lanes
    # never influence real lanes and produce exactly-zero output/counts.
    hidden_pad = ((hidden + 127) // 128) * 128

    xf = x.reshape(T, hidden)
    bias2 = balanced_bias.reshape(1, hidden).astype(jnp.float32)
    if hidden_pad != hidden:
        xf = jnp.pad(xf, ((0, 0), (0, hidden_pad - hidden)))
        bias2 = jnp.pad(bias2, ((0, 0), (0, hidden_pad - hidden)))
    offset = (jnp.arange(hidden_pad, dtype=jnp.int32) % bank_size).reshape(
        1, hidden_pad)

    itemsize = jnp.dtype(x.dtype).itemsize
    vmem_limit = _vmem_limit_bytes()
    TM = _choose_tm(T, hidden_pad, itemsize, max_tm, vmem_limit)
    grid0 = pl.cdiv(T, TM)

    is_pow2 = bank_size >= 2 and (bank_size & (bank_size - 1)) == 0
    log2_bs = max(1, bank_size.bit_length() - 1)
    use_butterfly = is_pow2 and (4 * topk * log2_bs) < (2 * (bank_size - 1))

    kernel = functools.partial(
        _balanced_topk_kernel, topk=topk, bank_size=bank_size,
        total_tokens=T, block_tokens=TM, use_butterfly=use_butterfly)

    out2, partial = pl.pallas_call(
        kernel,
        out_shape=(
            jax.ShapeDtypeStruct((T, hidden_pad), x.dtype),
            jax.ShapeDtypeStruct((grid0, 1, hidden_pad), jnp.float32),
        ),
        grid_spec=pltpu.PrefetchScalarGridSpec(
            num_scalar_prefetch=0,
            grid=(grid0,),
            in_specs=[
                pl.BlockSpec((TM, hidden_pad), lambda i: (i, 0)),
                pl.BlockSpec((1, hidden_pad), lambda i: (0, 0)),
                pl.BlockSpec((1, hidden_pad), lambda i: (0, 0)),
            ],
            out_specs=[
                pl.BlockSpec((TM, hidden_pad), lambda i: (i, 0)),
                pl.BlockSpec((1, 1, hidden_pad), lambda i: (i, 0, 0)),
            ],
        ),
        compiler_params=pltpu.CompilerParams(
            dimension_semantics=("parallel",),
            vmem_limit_bytes=vmem_limit,
        ),
    )(xf, bias2, offset)

    if hidden_pad != hidden:
        out2 = out2[:, :hidden]
    mask = out2.reshape(orig_shape)
    counts = jnp.sum(partial, axis=(0, 1))[:hidden]
    # TODO(synk): counts accumulate in f32 (exact only up to 2**24 per slot);
    #             bf16-native compute on v6e/v7x is not wired in (f32 compute).
    return mask, num_assigned_tokens + counts


def _reference(x, balanced_bias, topk, bank_size):
    """Pure-JAX reference of the PyTorch semantics."""
    hidden = x.shape[-1]
    nb = hidden // bank_size
    xf = x.reshape(-1, nb, bank_size)
    b = balanced_bias.reshape(nb, bank_size)
    score = jnp.abs(xf) + b
    _, ind = jax.lax.top_k(score, topk)                       # (T, NB, topk)
    onehot = jax.nn.one_hot(ind, bank_size, dtype=xf.dtype)   # (T, NB, topk, BS)
    m = jnp.sum(onehot, axis=-2)                              # (T, NB, BS) 0/1
    out = xf * m
    counts = jnp.sum((out != 0).astype(jnp.float32), axis=0).reshape(hidden)
    return out.reshape(x.shape), counts


if __name__ == "__main__":
    key = jax.random.PRNGKey(0)
    keys = jax.random.split(key, 10)

    def run_case(name, batch, seq, hidden, bank_size, topk, max_tm, kx, kb):
        x = jax.random.normal(kx, (batch, seq, hidden), dtype=jnp.float32)
        balanced_bias = 0.1 * jax.random.normal(kb, (hidden,), dtype=jnp.float32)
        nat0 = jnp.arange(hidden, dtype=jnp.float32)   # nonzero initial buffer
        mask, nat = balanced_topk(x, balanced_bias, topk, bank_size, nat0,
                                  max_tm=max_tm)
        jax.block_until_ready((mask, nat))
        ref_mask, ref_counts = _reference(x, balanced_bias, topk, bank_size)
        assert mask.shape == x.shape and nat.shape == (hidden,), name
        assert jnp.allclose(mask, ref_mask), f"{name}: mask mismatch"
        assert jnp.allclose(nat, nat0 + ref_counts), f"{name}: count mismatch"

    # Rank-select path, single grid block.
    run_case("rank_single_block", 2, 8, 128, 8, 2, _TM_MAX_DEFAULT,
             keys[0], keys[1])
    # Rank-select path, multiple grid blocks with a ragged last block
    # (T=18, TM=8 -> grid of 3, last block has 2 valid rows).
    run_case("rank_ragged_grid", 2, 9, 128, 8, 3, 8, keys[2], keys[3])
    # hidden padded 32 -> 128, ragged grid.
    run_case("hidden_padded", 2, 9, 32, 8, 3, 8, keys[4], keys[5])
    # Non-power-of-two bank_size, hidden padded 96 -> 128 (partial padded bank).
    run_case("non_pow2_bank", 2, 8, 96, 12, 3, _TM_MAX_DEFAULT,
             keys[6], keys[7])
    # Butterfly path (large pow2 bank, small topk), nb == 1.
    run_case("butterfly", 2, 8, 128, 128, 2, _TM_MAX_DEFAULT, keys[8], keys[9])

    print("KERNEL_OK")
</pallas_src>

<mosaic_0001>
module attributes {stable_mosaic.version = 11 : i64} {
  func.func @_balanced_topk_kernel(%arg0: i32, %arg1: memref<16x128xf32, #tpu.memory_space<vmem>>, %arg2: memref<1x128xf32, #tpu.memory_space<vmem>>, %arg3: memref<1x128xi32, #tpu.memory_space<vmem>>, %arg4: memref<16x128xf32, #tpu.memory_space<vmem>>, %arg5: memref<1x1x128xf32, #tpu.memory_space<vmem>>) attributes {dimension_semantics = [#tpu.dimension_semantics<parallel>], iteration_bounds = array<i64: 1>, scalar_prefetch = 0 : i64, scratch_operands = 0 : i64, tpu.core_type = #tpu.core_type<tc>, window_params = [{transform_indices = @transform_0, window_bounds = array<i64: 16, 128>}, {pipeline_mode = #tpu.pipeline_mode<synchronous>, transform_indices = @transform_1, window_bounds = array<i64: 1, 128>}, {pipeline_mode = #tpu.pipeline_mode<synchronous>, transform_indices = @transform_2, window_bounds = array<i64: 1, 128>}, {transform_indices = @transform_3, window_bounds = array<i64: 16, 128>}, {transform_indices = @transform_4, window_bounds = array<i64: 1, 1, 128>}]} {
    %c0 = arith.constant 0 : index
    %c0_0 = arith.constant 0 : index
    %0 = vector.load %arg1[%c0, %c0_0] : memref<16x128xf32, #tpu.memory_space<vmem>>, vector<16x128xf32>
    %1 = math.absf %0 : vector<16x128xf32>
    %c0_1 = arith.constant 0 : index
    %c0_2 = arith.constant 0 : index
    %2 = vector.load %arg2[%c0_1, %c0_2] : memref<1x128xf32, #tpu.memory_space<vmem>>, vector<1x128xf32>
    %3 = vector.broadcast %2 : vector<1x128xf32> to vector<16x128xf32>
    %4 = arith.addf %1, %3 : vector<16x128xf32>
    %c0_3 = arith.constant 0 : index
    %c0_4 = arith.constant 0 : index
    %5 = vector.load %arg3[%c0_3, %c0_4] : memref<1x128xi32, #tpu.memory_space<vmem>>, vector<1x128xi32>
    %c0_i32 = arith.constant 0 : i32
    %6 = vector.broadcast %c0_i32 : i32 to vector<16x128xi32>
    %c1_i32 = arith.constant 1 : i32
    %7 = tpu.dynamic_rotate %4 by %c1_i32 dim 1 : vector<16x128xf32>, i32 -> vector<16x128xf32>
    %c127_i32 = arith.constant 127 : i32
    %8 = tpu.dynamic_rotate %4 by %c127_i32 dim 1 : vector<16x128xf32>, i32 -> vector<16x128xf32>
    %c1_i32_5 = arith.constant 1 : i32
    %9 = vector.broadcast %c1_i32_5 : i32 to vector<1x128xi32>
    %10 = arith.cmpi sge, %5, %9 : vector<1x128xi32>
    %11 = arith.cmpf oge, %7, %4 : vector<16x128xf32>
    %12 = vector.broadcast %10 : vector<1x128xi1> to vector<16x128xi1>
    %13 = arith.andi %12, %11 : vector<16x128xi1>
    %14 = arith.extui %13 : vector<16x128xi1> to vector<16x128xi32>
    %15 = arith.addi %6, %14 : vector<16x128xi32>
    %c7_i32 = arith.constant 7 : i32
    %16 = vector.broadcast %c7_i32 : i32 to vector<1x128xi32>
    %17 = arith.cmpi slt, %5, %16 : vector<1x128xi32>
    %18 = arith.cmpf ogt, %8, %4 : vector<16x128xf32>
    %19 = vector.broadcast %17 : vector<1x128xi1> to vector<16x128xi1>
    %20 = arith.andi %19, %18 : vector<16x128xi1>
    %21 = arith.extui %20 : vector<16x128xi1> to vector<16x128xi32>
    %22 = arith.addi %15, %21 : vector<16x128xi32>
    %c2_i32 = arith.constant 2 : i32
    %23 = tpu.dynamic_rotate %4 by %c2_i32 dim 1 : vector<16x128xf32>, i32 -> vector<16x128xf32>
    %c126_i32 = arith.constant 126 : i32
    %24 = tpu.dynamic_rotate %4 by %c126_i32 dim 1 : vector<16x128xf32>, i32 -> vector<16x128xf32>
    %c2_i32_6 = arith.constant 2 : i32
    %25 = vector.broadcast %c2_i32_6 : i32 to vector<1x128xi32>
    %26 = arith.cmpi sge, %5, %25 : vector<1x128xi32>
    %27 = arith.cmpf oge, %23, %4 : vector<16x128xf32>
    %28 = vector.broadcast %26 : vector<1x128xi1> to vector<16x128xi1>
    %29 = arith.andi %28, %27 : vector<16x128xi1>
    %30 = arith.extui %29 : vector<16x128xi1> to vector<16x128xi32>
    %31 = arith.addi %22, %30 : vector<16x128xi32>
    %c6_i32 = arith.constant 6 : i32
    %32 = vector.broadcast %c6_i32 : i32 to vector<1x128xi32>
    %33 = arith.cmpi slt, %5, %32 : vector<1x128xi32>
    %34 = arith.cmpf ogt, %24, %4 : vector<16x128xf32>
    %35 = vector.broadcast %33 : vector<1x128xi1> to vector<16x128xi1>
    %36 = arith.andi %35, %34 : vector<16x128xi1>
    %37 = arith.extui %36 : vector<16x128xi1> to vector<16x128xi32>
    %38 = arith.addi %31, %37 : vector<16x128xi32>
    %c3_i32 = arith.constant 3 : i32
    %39 = tpu.dynamic_rotate %4 by %c3_i32 dim 1 : vector<16x128xf32>, i32 -> vector<16x128xf32>
    %c125_i32 = arith.constant 125 : i32
    %40 = tpu.dynamic_rotate %4 by %c125_i32 dim 1 : vector<16x128xf32>, i32 -> vector<16x128xf32>
    %c3_i32_7 = arith.constant 3 : i32
    %41 = vector.broadcast %c3_i32_7 : i32 to vector<1x128xi32>
    %42 = arith.cmpi sge, %5, %41 : vector<1x128xi32>
    %43 = arith.cmpf oge, %39, %4 : vector<16x128xf32>
    %44 = vector.broadcast %42 : vector<1x128xi1> to vector<16x128xi1>
    %45 = arith.andi %44, %43 : vector<16x128xi1>
    %46 = arith.extui %45 : vector<16x128xi1> to vector<16x128xi32>
    %47 = arith.addi %38, %46 : vector<16x128xi32>
    %c5_i32 = arith.constant 5 : i32
    %48 = vector.broadcast %c5_i32 : i32 to vector<1x128xi32>
    %49 = arith.cmpi slt, %5, %48 : vector<1x128xi32>
    %50 = arith.cmpf ogt, %40, %4 : vector<16x128xf32>
    %51 = vector.broadcast %49 : vector<1x128xi1> to vector<16x128xi1>
    %52 = arith.andi %51, %50 : vector<16x128xi1>
    %53 = arith.extui %52 : vector<16x128xi1> to vector<16x128xi32>
    %54 = arith.addi %47, %53 : vector<16x128xi32>
    %c4_i32 = arith.constant 4 : i32
    %55 = tpu.dynamic_rotate %4 by %c4_i32 dim 1 : vector<16x128xf32>, i32 -> vector<16x128xf32>
    %c124_i32 = arith.constant 124 : i32
    %56 = tpu.dynamic_rotate %4 by %c124_i32 dim 1 : vector<16x128xf32>, i32 -> vector<16x128xf32>
    %c4_i32_8 = arith.constant 4 : i32
    %57 = vector.broadcast %c4_i32_8 : i32 to vector<1x128xi32>
    %58 = arith.cmpi sge, %5, %57 : vector<1x128xi32>
    %59 = arith.cmpf oge, %55, %4 : vector<16x128xf32>
    %60 = vector.broadcast %58 : vector<1x128xi1> to vector<16x128xi1>
    %61 = arith.andi %60, %59 : vector<16x128xi1>
    %62 = arith.extui %61 : vector<16x128xi1> to vector<16x128xi32>
    %63 = arith.addi %54, %62 : vector<16x128xi32>
    %c4_i32_9 = arith.constant 4 : i32
    %64 = vector.broadcast %c4_i32_9 : i32 to vector<1x128xi32>
    %65 = arith.cmpi slt, %5, %64 : vector<1x128xi32>
    %66 = arith.cmpf ogt, %56, %4 : vector<16x128xf32>
    %67 = vector.broadcast %65 : vector<1x128xi1> to vector<16x128xi1>
    %68 = arith.andi %67, %66 : vector<16x128xi1>
    %69 = arith.extui %68 : vector<16x128xi1> to vector<16x128xi32>
    %70 = arith.addi %63, %69 : vector<16x128xi32>
    %c5_i32_10 = arith.constant 5 : i32
    %71 = tpu.dynamic_rotate %4 by %c5_i32_10 dim 1 : vector<16x128xf32>, i32 -> vector<16x128xf32>
    %c123_i32 = arith.constant 123 : i32
    %72 = tpu.dynamic_rotate %4 by %c123_i32 dim 1 : vector<16x128xf32>, i32 -> vector<16x128xf32>
    %c5_i32_11 = arith.constant 5 : i32
    %73 = vector.broadcast %c5_i32_11 : i32 to vector<1x128xi32>
    %74 = arith.cmpi sge, %5, %73 : vector<1x128xi32>
    %75 = arith.cmpf oge, %71, %4 : vector<16x128xf32>
    %76 = vector.broadcast %74 : vector<1x128xi1> to vector<16x128xi1>
    %77 = arith.andi %76, %75 : vector<16x128xi1>
    %78 = arith.extui %77 : vector<16x128xi1> to vector<16x128xi32>
    %79 = arith.addi %70, %78 : vector<16x128xi32>
    %c3_i32_12 = arith.constant 3 : i32
    %80 = vector.broadcast %c3_i32_12 : i32 to vector<1x128xi32>
    %81 = arith.cmpi slt, %5, %80 : vector<1x128xi32>
    %82 = arith.cmpf ogt, %72, %4 : vector<16x128xf32>
    %83 = vector.broadcast %81 : vector<1x128xi1> to vector<16x128xi1>
    %84 = arith.andi %83, %82 : vector<16x128xi1>
    %85 = arith.extui %84 : vector<16x128xi1> to vector<16x128xi32>
    %86 = arith.addi %79, %85 : vector<16x128xi32>
    %c6_i32_13 = arith.constant 6 : i32
    %87 = tpu.dynamic_rotate %4 by %c6_i32_13 dim 1 : vector<16x128xf32>, i32 -> vector<16x128xf32>
    %c122_i32 = arith.constant 122 : i32
    %88 = tpu.dynamic_rotate %4 by %c122_i32 dim 1 : vector<16x128xf32>, i32 -> vector<16x128xf32>
    %c6_i32_14 = arith.constant 6 : i32
    %89 = vector.broadcast %c6_i32_14 : i32 to vector<1x128xi32>
    %90 = arith.cmpi sge, %5, %89 : vector<1x128xi32>
    %91 = arith.cmpf oge, %87, %4 : vector<16x128xf32>
    %92 = vector.broadcast %90 : vector<1x128xi1> to vector<16x128xi1>
    %93 = arith.andi %92, %91 : vector<16x128xi1>
    %94 = arith.extui %93 : vector<16x128xi1> to vector<16x128xi32>
    %95 = arith.addi %86, %94 : vector<16x128xi32>
    %c2_i32_15 = arith.constant 2 : i32
    %96 = vector.broadcast %c2_i32_15 : i32 to vector<1x128xi32>
    %97 = arith.cmpi slt, %5, %96 : vector<1x128xi32>
    %98 = arith.cmpf ogt, %88, %4 : vector<16x128xf32>
    %99 = vector.broadcast %97 : vector<1x128xi1> to vector<16x128xi1>
    %100 = arith.andi %99, %98 : vector<16x128xi1>
    %101 = arith.extui %100 : vector<16x128xi1> to vector<16x128xi32>
    %102 = arith.addi %95, %101 : vector<16x128xi32>
    %c7_i32_16 = arith.constant 7 : i32
    %103 = tpu.dynamic_rotate %4 by %c7_i32_16 dim 1 : vector<16x128xf32>, i32 -> vector<16x128xf32>
    %c121_i32 = arith.constant 121 : i32
    %104 = tpu.dynamic_rotate %4 by %c121_i32 dim 1 : vector<16x128xf32>, i32 -> vector<16x128xf32>
    %c7_i32_17 = arith.constant 7 : i32
    %105 = vector.broadcast %c7_i32_17 : i32 to vector<1x128xi32>
    %106 = arith.cmpi sge, %5, %105 : vector<1x128xi32>
    %107 = arith.cmpf oge, %103, %4 : vector<16x128xf32>
    %108 = vector.broadcast %106 : vector<1x128xi1> to vector<16x128xi1>
    %109 = arith.andi %108, %107 : vector<16x128xi1>
    %110 = arith.extui %109 : vector<16x128xi1> to vector<16x128xi32>
    %111 = arith.addi %102, %110 : vector<16x128xi32>
    %c1_i32_18 = arith.constant 1 : i32
    %112 = vector.broadcast %c1_i32_18 : i32 to vector<1x128xi32>
    %113 = arith.cmpi slt, %5, %112 : vector<1x128xi32>
    %114 = arith.cmpf ogt, %104, %4 : vector<16x128xf32>
    %115 = vector.broadcast %113 : vector<1x128xi1> to vector<16x128xi1>
    %116 = arith.andi %115, %114 : vector<16x128xi1>
    %117 = arith.extui %116 : vector<16x128xi1> to vector<16x128xi32>
    %118 = arith.addi %111, %117 : vector<16x128xi32>
    %c2_i32_19 = arith.constant 2 : i32
    %119 = vector.broadcast %c2_i32_19 : i32 to vector<16x128xi32>
    %120 = arith.cmpi slt, %118, %119 : vector<16x128xi32>
    %cst = arith.constant 0.000000e+00 : f32
    %121 = vector.broadcast %cst : f32 to vector<16x128xf32>
    %122 = arith.select %120, %0, %121 : vector<16x128xi1>, vector<16x128xf32>
    %c0_20 = arith.constant 0 : index
    %c0_21 = arith.constant 0 : index
    %123 = vector.load %arg4[%c0_20, %c0_21] : memref<16x128xf32, #tpu.memory_space<vmem>>, vector<16x128xf32>
    tpu.vector_store %arg4[%c0_20, %c0_21], %122 {strides = array<i32>} : memref<16x128xf32, #tpu.memory_space<vmem>>, vector<16x128xf32>,
    %cst_22 = arith.constant 0.000000e+00 : f32
    %124 = vector.broadcast %cst_22 : f32 to vector<16x128xf32>
    %125 = arith.cmpf one, %122, %124 : vector<16x128xf32>
    %126 = arith.extui %125 : vector<16x128xi1> to vector<16x128xi32>
    %127 = arith.sitofp %126 : vector<16x128xi32> to vector<16x128xf32>
    %128 = arith.truncf %127 : vector<16x128xf32> to vector<16x128xbf16>
    %129 = tpu.iota {dimensions = array<i32: 1>} : vector<1x16xi32>
    %c16_i32 = arith.constant 16 : i32
    %130 = arith.muli %arg0, %c16_i32 : i32
    %131 = vector.broadcast %130 : i32 to vector<1x16xi32>
    %132 = arith.addi %131, %129 : vector<1x16xi32>
    %c16_i32_23 = arith.constant 16 : i32
    %133 = vector.broadcast %c16_i32_23 : i32 to vector<1x16xi32>
    %134 = arith.cmpi slt, %132, %133 : vector<1x16xi32>
    %135 = arith.extui %134 : vector<1x16xi1> to vector<1x16xi32>
    %136 = arith.sitofp %135 : vector<1x16xi32> to vector<1x16xf32>
    %137 = arith.truncf %136 : vector<1x16xf32> to vector<1x16xbf16>
    %cst_24 = arith.constant dense<0.000000e+00> : vector<1x128xf32>
    %138 = tpu.matmul %137, %128, %cst_24 {dimension_numbers = #tpu.dot_dimension_numbers<[1], [0], [0], [1], [0, 0, 1, 1], [], []>} : vector<1x16xbf16>, vector<16x128xbf16>, vector<1x128xf32> -> vector<1x128xf32>
    %139 = vector.shape_cast %138 : vector<1x128xf32> to vector<1x1x128xf32>
    %c0_25 = arith.constant 0 : index
    %c0_26 = arith.constant 0 : index
    %c0_27 = arith.constant 0 : index
    %140 = vector.load %arg5[%c0_25, %c0_26, %c0_27] : memref<1x1x128xf32, #tpu.memory_space<vmem>>, vector<1x1x128xf32>
    tpu.vector_store %arg5[%c0_25, %c0_26, %c0_27], %139 {strides = array<i32>} : memref<1x1x128xf32, #tpu.memory_space<vmem>>, vector<1x1x128xf32>,
    return
  }
  func.func @transform_0(%arg0: i32) -> (i32, i32) {
    %c0_i32 = arith.constant 0 : i32
    %c0_i32_0 = arith.constant 0 : i32
    return %arg0, %c0_i32 : i32, i32
  }
  func.func @transform_1(%arg0: i32) -> (i32, i32) {
    %c0_i32 = arith.constant 0 : i32
    %c0_i32_0 = arith.constant 0 : i32
    %c0_i32_1 = arith.constant 0 : i32
    return %c0_i32, %c0_i32_0 : i32, i32
  }
  func.func @transform_2(%arg0: i32) -> (i32, i32) {
    %c0_i32 = arith.constant 0 : i32
    %c0_i32_0 = arith.constant 0 : i32
    %c0_i32_1 = arith.constant 0 : i32
    return %c0_i32, %c0_i32_0 : i32, i32
  }
  func.func @transform_3(%arg0: i32) -> (i32, i32) {
    %c0_i32 = arith.constant 0 : i32
    %c0_i32_0 = arith.constant 0 : i32
    return %arg0, %c0_i32 : i32, i32
  }
  func.func @transform_4(%arg0: i32) -> (i32, i32, i32) {
    %c0_i32 = arith.constant 0 : i32
    %c0_i32_0 = arith.constant 0 : i32
    %c0_i32_1 = arith.constant 0 : i32
    return %arg0, %c0_i32, %c0_i32_0 : i32, i32, i32
  }
}

</mosaic_0001>

<bundles_post_ra>
// kernel: tpu_custom_call.1
= control target key start
LH: loop header
LB: loop body
LE: loop exit
PB: predicated region body
PF: predicated region fallthrough
CT: control target
= control target key end

     0   :  { %10 = vsyncpa [#allocation3], 0  ;;  %s964_s0 = inlined_call_operand.hbm [shape: f32[16,128], index: 0, kind: input, shape index: {}]   ;;  %s965_s1 = inlined_call_operand.vmem [shape: f32[1,128], index: 1, kind: input, shape index: {}]   ;;  %s966_s2 = inlined_call_operand.vmem [shape: s32[1,128], index: 2, kind: input, shape index: {}]   ;;  %s967_s3 = inlined_call_operand.hbm [shape: f32[16,128], index: 3, kind: output, shape index: {0}]   ;;  %s968_s4 = inlined_call_operand.hbm [shape: f32[1,1,128], index: 4, kind: output, shape index: {1}]  }
   0x1   :  { %11 = vsyncpa [#allocation4], 0 }
   0x2   :  { %12 = vsyncpa [#allocation7], 0  ;;  %s513_s15 = smov [#allocation2]  }
   0x3   :  { %s18_s16 = sshll.u32 %s513_s15, 4  ;;  %s19_s16 = int_to_ptr.vmem [resolvable:$true] %s18_s16 }
   0x4   :  { %s455_s17 = scalar_lea.vmem %s19_s16, 256  ;;  %p460_p1 = scmp.lt.s32.totalorder %s19_s16, %s19_s16 }
   0x5   :  { %p456_p0 = scmp.ne.s32.totalorder %s19_s16, %s455_s17  ;;  %p461_p2 = scmp.lt.s32.totalorder %s455_s17, %s455_s17 }
   0x7   :  { %p462_p3 = por %p461_p2, %p460_p1 }
   0x9   :  { %p463_p4 = pnand %p462_p3, %p456_p0 }
   0xb   :  { %466 = shalt.err (!%p463_p4)
}
   0xc   :  { %s514_s18 = smov 128   ;;  %s515_s19 = smov 8  }
   0xd   :  { %24 = dma.hbm_to_vmem [thread:$0]  %s964_s0, 256, %s19_s16, [#allocation3], %s514_s18, %s514_s18, %s515_s19  }
   0xe   :  { %507 = dma.done.wait [#allocation3], 256  }
   0xf   :  { %508 = vsyncadd [#allocation3], 4294967040  ;;  %v567_v0 = vld [vmem:[#allocation2] sm:$0xff]  ;;  %v569_v1 = vld [vmem:[#allocation2 + $0x8] sm:$0xff]  ;;  %s516_s24 = smov 127   ;;  %s517_s0 = smov 1   ;;  %v59_v12 = vlaneseq }
  0x10   :  { %v409_v2 = vld [vmem:[%s965_s1] ss:$0 sm:$0xff]  ;;  %v35_v3 = vand.u32 2147483647, %v567_v0  ;;  %v36_v4 = vand.u32 2147483647, %v569_v1 }
  0x11   :  { %s518_s25 = smov 2   ;;  %s519_s1 = smov 126   ;;  %v528_v7 = vmov 0.0   ;;  %vm530_vm0 = vmmov 0   ;;  %v613_v13 = vld [vmem:[%s966_s2] sm:$0x1] }
  0x12   :  { %v576_v5 = vadd.f32 %v409_v2, %v35_v3  ;;  %v578_v6 = vadd.f32 %v409_v2, %v36_v4  ;;  %s520_s26 = smov 3   ;;  %s521_s27 = smov 125   ;;  %418 = vmatprep.subr.bf16.mxu0 %v528_v7  ;;  %420 = vmatprep.mubr.msk.bf16.mxu0 %vm530_vm0, %v528_v7  ;;  %v60_v16 = vshrl.u32 %v59_v12, 7  ;;  %vm68_vm1 = vcmp.lt.s32.totalorder %v613_v13, 7 }
  0x13   :  { %s522_s28 = smov 4   ;;  %s523_s29 = smov 124   ;;  %vm55_vm2 = vcmp.ge.s32.totalorder %v613_v13, 1  ;;  %v532_v20 = vmov 0   ;;  %vm91_vm3 = vcmp.ge.s32.totalorder %v613_v13, 2  ;;  %vm106_vm4 = vcmp.lt.s32.totalorder %v613_v13, 6 }
  0x14   :  { %51 = vrot.lane.b32.xlu1 %v576_v5, %s516_s24  ;;  %47 = vrot.lane.b32.xlu0 %v576_v5, %s517_s0  ;;  %s524_s30 = smov 5   ;;  %s525_s5 = smov 123   ;;  %v623_v19 = vsub.s32 0, %v60_v16  ;;  %v71_v21 = vsel %vm68_vm1, 1, %v532_v20  ;;  %v58_v22 = vsel %vm55_vm2, 1, %v532_v20  ;;  %v94_v26 = vsel %vm91_vm3, 1, %v532_v20 }
  0x15   :  { %s526_s6 = smov 6   ;;  %s527_s7 = smov 122   ;;  %vm129_vm5 = vcmp.ge.s32.totalorder %v613_v13, 3  ;;  %vm144_vm6 = vcmp.lt.s32.totalorder %v613_v13, 5  ;;  %v109_v28 = vsel %vm106_vm4, 1, %v532_v20  ;;  %vm167_vm7 = vcmp.ge.s32.totalorder %v613_v13, 4 }
  0x16   :  { %s529_s8 = smov 7   ;;  %s531_s9 = smov 121   ;;  %v75_v25 = vrot.slane %v71_v21, %v623_v19  ;;  %v62_v27 = vrot.slane %v58_v22, %v623_v19  ;;  %v98_v29 = vrot.slane %v94_v26, %v623_v19  ;;  %v132_v30 = vsel %vm129_vm5, 1, %v532_v20 }
  0x17   :  { %v147_v31 = vsel %vm144_vm6, 1, %v532_v20  ;;  %vm182_vm8 = vcmp.lt.s32.totalorder %v613_v13, 4  ;;  %v113_v35 = vrot.slane %v109_v28, %v623_v19  ;;  %v170_v36 = vsel %vm167_vm7, 1, %v532_v20  ;;  %s534_s2 = smov [#allocation5]  }
  0x18   :  { %53 = vrot.lane.b32.xlu1 %v578_v6, %s516_s24  ;;  %49 = vrot.lane.b32.xlu0 %v578_v6, %s517_s0  ;;  %vm649_vm9 = vcmp.eq.s32.totalorder %v75_v25, 1  ;;  %vm205_vm12 = vcmp.ge.s32.totalorder %v613_v13, 5  ;;  %v136_v37 = vrot.slane %v132_v30, %v623_v19  ;;  %v151_v38 = vrot.slane %v147_v31, %v623_v19  ;;  %s383_s12 = sshll.u32 %s534_s2, 4  ;;  %s384_s12 = int_to_ptr.vmem [resolvable:$true] %s383_s12 }
  0x19   :  { %v185_v39 = vsel %vm182_vm8, 1, %v532_v20  ;;  %vm63_vm15 = vcmp.eq.s32.totalorder %v62_v27, 1  ;;  %vm669_vm1 = vcmp.eq.s32.totalorder %v98_v29, 1  ;;  %v174_v45 = vrot.slane %v170_v36, %v623_v19  ;;  %s467_s13 = scalar_lea.vmem %s384_s12, 256  ;;  %p472_p6 = scmp.lt.s32.totalorder %s384_s12, %s384_s12 }
  0x1a   :  { %v208_v46 = vsel %vm205_vm12, 1, %v532_v20  ;;  %vm220_vm4 = vcmp.lt.s32.totalorder %v613_v13, 3  ;;  %v189_v48 = vrot.slane %v185_v39, %v623_v19  ;;  %vm698_vm8 = vcmp.eq.s32.totalorder %v113_v35, 1  ;;  %p468_p5 = scmp.ne.s32.totalorder %s384_s12, %s467_s13  ;;  %p473_p7 = scmp.lt.s32.totalorder %s467_s13, %s467_s13 }
  0x1b   :  { %v212_v56 = vrot.slane %v208_v46, %v623_v19  ;;  %v223_v57 = vsel %vm220_vm4, 1, %v532_v20  ;;  %vm736_vm4 = vcmp.eq.s32.totalorder %v174_v45, 1  ;;  %v325_v29 = vand.u32 127, %v59_v12 }
  0x1c   :  { %85 = vrot.lane.b32.xlu1 %v578_v6, %s518_s25  ;;  %83 = vrot.lane.b32.xlu0 %v576_v5, %s518_s25  ;;  %p474_p8 = por %p473_p7, %p472_p6 }
  0x1e   :  { %p475_p9 = pnand %p474_p8, %p468_p5 }
  0x20   :  { %89 = vrot.lane.b32.xlu1 %v578_v6, %s519_s1  ;;  %87 = vrot.lane.b32.xlu0 %v576_v5, %s519_s1 }
  0x24   :  { %123 = vrot.lane.b32.xlu1 %v578_v6, %s520_s26  ;;  %121 = vrot.lane.b32.xlu0 %v576_v5, %s520_s26 }
  0x28   :  { %127 = vrot.lane.b32.xlu1 %v578_v6, %s521_s27  ;;  %125 = vrot.lane.b32.xlu0 %v576_v5, %s521_s27 }
  0x2c   :  { %161 = vrot.lane.b32.xlu1 %v578_v6, %s522_s28  ;;  %159 = vrot.lane.b32.xlu0 %v576_v5, %s522_s28 }
  0x30   :  { %165 = vrot.lane.b32.xlu1 %v578_v6, %s523_s29  ;;  %163 = vrot.lane.b32.xlu0 %v576_v5, %s523_s29 }
  0x34   :  { %199 = vrot.lane.b32.xlu1 %v578_v6, %s524_s30  ;;  %197 = vrot.lane.b32.xlu0 %v576_v5, %s524_s30 }
  0x38   :  { %203 = vrot.lane.b32.xlu1 %v578_v6, %s525_s5  ;;  %201 = vrot.lane.b32.xlu0 %v576_v5, %s525_s5 }
  0x3c   :  { %237 = vrot.lane.b32.xlu1 %v578_v6, %s526_s6  ;;  %235 = vrot.lane.b32.xlu0 %v576_v5, %s526_s6 }
  0x40   :  { %241 = vrot.lane.b32.xlu1 %v578_v6, %s527_s7  ;;  %239 = vrot.lane.b32.xlu0 %v576_v5, %s527_s7 }
  0x44   :  { %275 = vrot.lane.b32.xlu1 %v578_v6, %s529_s8  ;;  %273 = vrot.lane.b32.xlu0 %v576_v5, %s529_s8 }
  0x48   :  { %279 = vrot.lane.b32.xlu1 %v578_v6, %s531_s9  ;;  %277 = vrot.lane.b32.xlu0 %v576_v5, %s531_s9 }
  0x86   :  { %v52_v8 = vpop.permute.xlu1 %51  ;;  %v48_v9 = vpop.permute.xlu0 %47 }
  0x87   :  { %vm69_vm10 = vcmp.gt.f32.partialorder %v52_v8, %v576_v5  ;;  %vm56_vm0 = vcmp.ge.f32.partialorder %v48_v9, %v576_v5  ;;  %v227_v8 = vrot.slane %v223_v57, %v623_v19 }
  0x88   :  { %vm664_vm14 = vmand %vm649_vm9, %vm69_vm10  ;;  %vm704_vm10 = vcmp.eq.s32.totalorder %v136_v37, 1 }
  0x89   :  { %vm694_vm7 = vmand %vm63_vm15, %vm56_vm0  ;;  %v79_v61 = vsel %vm664_vm14, 1, %v532_v20 }
  0x8a   :  { %v54_v10 = vpop.permute.xlu1 %53  ;;  %v50_v11 = vpop.permute.xlu0 %49  ;;  %v66_v62 = vsel %vm694_vm7, 1, %v532_v20 }
  0x8b   :  { %vm70_vm11 = vcmp.gt.f32.partialorder %v54_v10, %v578_v6  ;;  %vm57_vm13 = vcmp.ge.f32.partialorder %v50_v11, %v578_v6 }
  0x8c   :  { %vm677_vm2 = vmand %vm649_vm9, %vm70_vm11  ;;  %vm708_vm11 = vcmp.eq.s32.totalorder %v151_v38, 1 }
  0x8d   :  { %vm687_vm5 = vmand %vm63_vm15, %vm57_vm13  ;;  %vm243_vm15 = vcmp.ge.s32.totalorder %v613_v13, 6  ;;  %v80_v58 = vsel %vm677_vm2, 1, %v532_v20 }
  0x8e   :  { %v86_v14 = vpop.permute.xlu1 %85  ;;  %v615_v15 = vpop.permute.xlu0 %83  ;;  %v67_v59 = vsel %vm687_vm5, 1, %v532_v20  ;;  %vm757_vm5 = vcmp.eq.s32.totalorder %v189_v48, 1  ;;  %v246_v9 = vsel %vm243_vm15, 1, %v532_v20  ;;  %vm258_vm15 = vcmp.lt.s32.totalorder %v613_v13, 2 }
  0x8f   :  { %vm93_vm3 = vcmp.ge.f32.partialorder %v86_v14, %v578_v6  ;;  %vm92_vm6 = vcmp.ge.f32.partialorder %v615_v15, %v576_v5  ;;  %v82_v10 = vadd.s32 %v80_v58, %v67_v59  ;;  %v261_v35 = vsel %vm258_vm15, 1, %v532_v20 }
  0x90   :  { %vm714_vm12 = vmand %vm669_vm1, %vm93_vm3  ;;  %v265_v45 = vrot.slane %v261_v35, %v623_v19 }
  0x91   :  { %vm100_vm0 = vmand %vm669_vm1, %vm92_vm6  ;;  %v103_v3 = vsel %vm714_vm12, 1, %v532_v20 }
  0x92   :  { %v619_v17 = vpop.permute.xlu1 %89  ;;  %v621_v18 = vpop.permute.xlu0 %87  ;;  %v102_v11 = vsel %vm100_vm0, 1, %v532_v20  ;;  %v105_v22 = vadd.s32 %v103_v3, %v82_v10 }
  0x93   :  { %vm108_vm9 = vcmp.gt.f32.partialorder %v619_v17, %v578_v6  ;;  %vm107_vm13 = vcmp.gt.f32.partialorder %v621_v18, %v576_v5  ;;  %v81_v18 = vadd.s32 %v79_v61, %v66_v62 }
  0x94   :  { %vm751_vm1 = vmand %vm698_vm8, %vm108_vm9  ;;  %vm786_vm9 = vcmp.eq.s32.totalorder %v212_v56, 1 }
  0x95   :  { %vm769_vm14 = vmand %vm698_vm8, %vm107_vm13  ;;  %v118_v21 = vsel %vm751_vm1, 1, %v532_v20  ;;  %v104_v26 = vadd.s32 %v102_v11, %v81_v18 }
  0x96   :  { %v630_v23 = vpop.permute.xlu1 %123  ;;  %v632_v24 = vpop.permute.xlu0 %121  ;;  %v120_v30 = vadd.s32 %v118_v21, %v105_v22 }
  0x97   :  { %vm131_vm3 = vcmp.ge.f32.partialorder %v630_v23, %v578_v6  ;;  %vm130_vm2 = vcmp.ge.f32.partialorder %v632_v24, %v576_v5  ;;  %v117_v23 = vsel %vm769_vm14, 1, %v532_v20  ;;  %v250_v24 = vrot.slane %v246_v9, %v623_v19 }
  0x98   :  { %vm780_vm7 = vmand %vm704_vm10, %vm131_vm3  ;;  %v119_v36 = vadd.s32 %v117_v23, %v104_v26 }
  0x99   :  { %vm138_vm12 = vmand %vm704_vm10, %vm130_vm2  ;;  %v141_v27 = vsel %vm780_vm7, 1, %v532_v20  ;;  %vm828_vm2 = vcmp.eq.s32.totalorder %v227_v8, 1 }
  0x9a   :  { %v644_v32 = vpop.permute.xlu1 %127  ;;  %v646_v33 = vpop.permute.xlu0 %125  ;;  %v140_v31 = vsel %vm138_vm12, 1, %v532_v20  ;;  %v143_v38 = vadd.s32 %v141_v27, %v120_v30 }
  0x9b   :  { %vm146_vm6 = vcmp.gt.f32.partialorder %v644_v32, %v578_v6  ;;  %vm145_vm8 = vcmp.gt.f32.partialorder %v646_v33, %v576_v5 }
  0x9c   :  { %vm808_vm0 = vmand %vm708_vm11, %vm146_vm6 }
  0x9d   :  { %vm823_vm3 = vmand %vm708_vm11, %vm145_vm8  ;;  %v156_v37 = vsel %vm808_vm0, 1, %v532_v20  ;;  %vm281_vm8 = vcmp.ge.s32.totalorder %v613_v13, 7 }
  0x9e   :  { %v162_v42 = vpop.permute.xlu1 %161  ;;  %v673_v43 = vpop.permute.xlu0 %159  ;;  %v155_v39 = vsel %vm823_vm3, 1, %v532_v20  ;;  %v158_v46 = vadd.s32 %v156_v37, %v143_v38  ;;  %v284_v50 = vsel %vm281_vm8, 1, %v532_v20  ;;  %v533_v38 = vmov 1.0|1.0  }
  0x9f   :  { %vm169_vm13 = vcmp.ge.f32.partialorder %v162_v42, %v578_v6  ;;  %vm168_vm10 = vcmp.ge.f32.partialorder %v673_v43, %v576_v5  ;;  %v142_v42 = vadd.s32 %v140_v31, %v119_v36  ;;  %v288_v57 = vrot.slane %v284_v50, %v623_v19 }
  0xa0   :  { %vm835_vm14 = vmand %vm736_vm4, %vm169_vm13 }
  0xa1   :  { %vm176_vm6 = vmand %vm736_vm4, %vm168_vm10  ;;  %vm865_vm4 = vcmp.eq.s32.totalorder %v250_v24, 1  ;;  %v179_v43 = vsel %vm835_vm14, 1, %v532_v20  ;;  %v157_v51 = vadd.s32 %v155_v39, %v142_v42  ;;  %vm296_vm14 = vcmp.lt.s32.totalorder %v613_v13, 1 }
  0xa2   :  { %v166_v54 = vpop.permute.xlu1 %165  ;;  %v164_v55 = vpop.permute.xlu0 %163  ;;  %v178_v47 = vsel %vm176_vm6, 1, %v532_v20  ;;  %v181_v53 = vadd.s32 %v179_v43, %v158_v46  ;;  %v299_v62 = vsel %vm296_vm14, 1, %v532_v20 }
  0xa3   :  { %vm184_vm1 = vcmp.gt.f32.partialorder %v166_v54, %v578_v6  ;;  %vm183_vm11 = vcmp.gt.f32.partialorder %v164_v55, %v576_v5  ;;  %v180_v55 = vadd.s32 %v178_v47, %v157_v51  ;;  %v303_v11 = vrot.slane %v299_v62, %v623_v19 }
  0xa4   :  { %vm860_vm12 = vmand %vm757_vm5, %vm184_vm1 }
  0xa5   :  { %vm876_vm15 = vmand %vm757_vm5, %vm183_vm11  ;;  %v194_v52 = vsel %vm860_vm12, 1, %v532_v20  ;;  %vm304_vm14 = vcmp.eq.s32.totalorder %v303_v11, 1 }
  0xa6   :  { %v200_v16 = vpop.permute.xlu1 %199  ;;  %v198_v17 = vpop.permute.xlu0 %197  ;;  %v193_v54 = vsel %vm876_vm15, 1, %v532_v20  ;;  %v196_v58 = vadd.s32 %v194_v52, %v181_v53 }
  0xa7   :  { %vm207_vm7 = vcmp.ge.f32.partialorder %v200_v16, %v578_v6  ;;  %vm206_vm13 = vcmp.ge.f32.partialorder %v198_v17, %v576_v5  ;;  %v195_v63 = vadd.s32 %v193_v54, %v180_v55 }
  0xa8   :  { %vm215_vm10 = vmand %vm786_vm9, %vm207_vm7  ;;  %vm911_vm7 = vcmp.eq.s32.totalorder %v265_v45, 1 }
  0xa9   :  { %vm214_vm5 = vmand %vm786_vm9, %vm206_vm13  ;;  %v217_v56 = vsel %vm215_vm10, 1, %v532_v20  ;;  %vm931_vm10 = vcmp.eq.s32.totalorder %v288_v57, 1 }
  0xaa   :  { %v204_v33 = vpop.permute.xlu1 %203  ;;  %v202_v34 = vpop.permute.xlu0 %201  ;;  %v216_v59 = vsel %vm214_vm5, 1, %v532_v20  ;;  %v219_v3 = vadd.s32 %v217_v56, %v196_v58 }
  0xab   :  { %vm222_vm0 = vcmp.gt.f32.partialorder %v204_v33, %v578_v6  ;;  %vm221_vm3 = vcmp.gt.f32.partialorder %v202_v34, %v576_v5  ;;  %v218_v8 = vadd.s32 %v216_v59, %v195_v63 }
  0xac   :  { %vm230_vm11 = vmand %vm828_vm2, %vm222_vm0 }
  0xad   :  { %vm229_vm9 = vmand %vm828_vm2, %vm221_vm3  ;;  %v232_v2 = vsel %vm230_vm11, 1, %v532_v20 }
  0xae   :  { %v238_v48 = vpop.permute.xlu1 %237  ;;  %v236_v49 = vpop.permute.xlu0 %235  ;;  %v231_v4 = vsel %vm229_vm9, 1, %v532_v20  ;;  %v234_v14 = vadd.s32 %v232_v2, %v219_v3 }
  0xaf   :  { %vm245_vm1 = vcmp.ge.f32.partialorder %v238_v48, %v578_v6  ;;  %vm244_vm6 = vcmp.ge.f32.partialorder %v236_v49, %v576_v5  ;;  %v233_v18 = vadd.s32 %v231_v4, %v218_v8 }
  0xb0   :  { %vm253_vm8 = vmand %vm865_vm4, %vm245_vm1 }
  0xb1   :  { %vm252_vm2 = vmand %vm865_vm4, %vm244_vm6  ;;  %v255_v9 = vsel %vm253_vm8, 1, %v532_v20  ;;  %vm329_vm8 = vcmp.lt.s32.totalorder %v325_v29, 16 }
  0xb2   :  { %v242_v60 = vpop.permute.xlu1 %241  ;;  %v240_v61 = vpop.permute.xlu0 %239  ;;  %v254_v15 = vsel %vm252_vm2, 1, %v532_v20  ;;  %v257_v22 = vadd.s32 %v255_v9, %v234_v14  ;;  %v412_v12 = vsel %vm329_vm8, 1.0, %v528_v7 }
  0xb3   :  { %vm260_vm12 = vcmp.gt.f32.partialorder %v242_v60, %v578_v6  ;;  %vm259_vm13 = vcmp.gt.f32.partialorder %v240_v61, %v576_v5  ;;  %v256_v25 = vadd.s32 %v254_v15, %v233_v18 }
  0xb4   :  { %vm268_vm15 = vmand %vm911_vm7, %vm260_vm12 }
  0xb5   :  { %vm267_vm0 = vmand %vm911_vm7, %vm259_vm13  ;;  %v270_v21 = vsel %vm268_vm15, 1, %v532_v20 }
  0xb6   :  { %v276_v16 = vpop.permute.xlu1 %275  ;;  %v274_v17 = vpop.permute.xlu0 %273  ;;  %v269_v23 = vsel %vm267_vm0, 1, %v532_v20  ;;  %v272_v24 = vadd.s32 %v270_v21, %v257_v22 }
  0xb7   :  { %vm283_vm4 = vcmp.ge.f32.partialorder %v276_v16, %v578_v6  ;;  %vm282_vm3 = vcmp.ge.f32.partialorder %v274_v17, %v576_v5  ;;  %v271_v30 = vadd.s32 %v269_v23, %v256_v25 }
  0xb8   :  { %vm291_vm5 = vmand %vm931_vm10, %vm283_vm4 }
  0xb9   :  { %v293_v19 = vsel %vm291_vm5, 1, %v532_v20  ;;  %vm290_vm1 = vmand %vm931_vm10, %vm282_vm3  ;;  %vm333_vm10 = vcmask 130048  }
  0xba   :  { %v292_v26 = vsel %vm290_vm1, 1, %v532_v20  ;;  %v280_v27 = vpop.permute.xlu1 %279  ;;  %v278_v28 = vpop.permute.xlu0 %277  ;;  %v295_v31 = vadd.s32 %v293_v19, %v272_v24 }
  0xbb   :  { %vm298_vm11 = vcmp.gt.f32.partialorder %v280_v27, %v578_v6  ;;  %vm297_vm6 = vcmp.gt.f32.partialorder %v278_v28, %v576_v5  ;;  %v294_v32 = vadd.s32 %v292_v26, %v271_v30  ;;  %v332_v5 = vpack.c.bf16 %v412_v12, %v412_v12 }
  0xbc   :  { %vm306_vm9 = vmand %vm304_vm14, %vm298_vm11 }
  0xbd   :  { %v308_v33 = vsel %vm306_vm9, 1, %v532_v20  ;;  %vm305_vm7 = vmand %vm304_vm14, %vm297_vm6 }
  0xbe   :  { %v310_v34 = vadd.s32 %v308_v33, %v295_v31  ;;  %v307_v35 = vsel %vm305_vm7, 1, %v532_v20 }
  0xbf   :  { %v309_v36 = vadd.s32 %v307_v35, %v294_v32 }
  0xc0   :  { %vm312_vm2 = vcmp.lt.s32.totalorder %v310_v34, 2 }
  0xc1   :  { %vm311_vm12 = vcmp.lt.s32.totalorder %v309_v36, 2  ;;  %v314_v37 = vsel %vm312_vm2, %v569_v1, 0.0 }
  0xc2   :  { %v313_v6 = vsel %vm311_vm12, %v567_v0, 0.0  ;;  %vm318_vm13 = vcmp.ne.f32.partialorder %v314_v37, 0.0  ;;  %316 = vst [vmem:[#allocation5 + $0x8] sm:$0xff] %v314_v37 }
  0xc3   :  { %vm317_vm15 = vcmp.ne.f32.partialorder %v313_v6, 0.0  ;;  %315 = vst [vmem:[#allocation5] sm:$0xff] %v313_v6 }
  0xc4   :  { %vm413_vm0 = vmpackc.low %vm318_vm13, %vm317_vm15 }
  0xc5   :  { %419 = vmatpush3.bf16.msk.msra.mxu0 %vm413_vm0, %v533_v38 }
  0xc8   :  { %421 = vmatmul.mubr.msk.bf16.vlgmr.msra.gmra.mxu0 %vm333_vm10, %v332_v5 }
  0xc9   :  { %478 = shalt.err (!%p475_p9)
}
  0xca   :  { %389 = dma.vmem_to_hbm [thread:$0]  %s384_s12, 256, %s967_s3, [#allocation4], %s514_s18, %s514_s18, %s515_s19  }
  0xcb   :  { %s535_s16 = smov [#allocation6]  }
  0xcc   :  { %s396_s17 = sshll.u32 %s535_s16, 4  ;;  %s397_s17 = int_to_ptr.vmem [resolvable:$true] %s396_s17 }
  0xcd   :  { %s487_s20 = scalar_lea.vmem %s397_s17, 16  ;;  %s491_s21 = scalar_lea.vmem %s397_s17, 32 }
  0xce   :  { %p488_p10 = scmp.ne.s32.totalorder %s397_s17, %s487_s20  ;;  %p492_p11 = scmp.lt.s32.totalorder %s397_s17, %s397_s17 }
  0xcf   :  { %p493_p12 = scmp.lt.s32.totalorder %s491_s21, %s487_s20 }
  0xd1   :  { %p494_p13 = por %p493_p12, %p492_p11 }
  0xd3   :  { %p495_p0 = pnand %p494_p13, %p488_p10 }
 0x188   :  { %v371_v0 = vpop.f32.mrf.mxu0 }
 0x189   :  { %377 = vst [vmem:[#allocation6] sm:$0x1] %v371_v0 }
 0x18a   :  { %v422_v1 = vpop.f32.mrf.mxu0 }
 0x18b   :  { %498 = shalt.err (!%p495_p0)
}
 0x18c   :  { %399 = dma.vmem_to_hbm [thread:$0]  %s397_s17, 16, %s968_s4, [#allocation7]   ;;  %v374_v7 = vpop.f32.mrf.mxu0 }
 0x18e   :  { %v423_v20 = vpop.f32.mrf.mxu0 }
 0x18f   :  { %509 = dma.done.wait [#allocation4], 256  }
 0x190   :  { %510 = vsyncadd [#allocation4], 4294967040 }
 0x191   :  { %511 = dma.done.wait [#allocation7], 16  }
 0x192   :  { %512 = vsyncadd [#allocation7], 4294967280 }
 0x193   :  { %406 = vsyncpa [#allocation3], 1 }
 0x194   :  { %407 = vsyncpa [#allocation4], 1 }
 0x195   :  { %408 = vsyncpa [#allocation7], 1 }

</bundles_post_ra>
